<compile_context>
chip_gen: v7x
topology: tpu7x:2x2x1
jax: 0.10.0
libtpu: 0.0.40
codegen_flags: <defaults>
</compile_context>

<pallas_src>
import jax
import jax.numpy as jnp
import numpy as np
from jax import lax
from jax.experimental import pallas as pl
from jax.experimental.pallas import tpu as pltpu

hidden_dim = 32
input_size = 1
n_layers = 1
output_size = 1
seq_len = 20

OUT_LANES = 128  # lane-dense padding for the FC output (review: out_spec lever)


def rnn_kernel(x_ref, h0_ref, wih_ref, whh_ref, b_ref, wfc_ref, bfc_ref,
               out_ref, hfin_ref, h_all_ref):
    # x_ref     : (seq*bp, input_size)    VMEM  (time-major, batch padded to bp=8k)
    # h0_ref    : (bp, hidden)            VMEM  (padded rows are zero)
    # wih_ref   : (input_size, hidden)    VMEM  (transposed PyTorch weight_ih)
    # whh_ref   : (hidden, hidden)        VMEM  (transposed PyTorch weight_hh)
    # b_ref     : (1, hidden)             VMEM  (b_ih + b_hh)
    # wfc_ref   : (hidden, OUT_LANES)     VMEM  (transposed fc.weight, lane-padded)
    # bfc_ref   : (1, OUT_LANES)          VMEM  (fc bias, lane-padded)
    # out_ref   : (seq*bp, OUT_LANES)     VMEM  (lane-dense FC output)
    # hfin_ref  : (bp, hidden)            VMEM  (final hidden state, padded rows)
    # h_all_ref : (seq*bp, hidden)        VMEM scratch collecting all h_t
    bp = h0_ref.shape[0]                       # padded batch (multiple of 8)
    seq = x_ref.shape[0] // bp

    # (1) Input projection for ALL timesteps at once, on the VPU.
    #     K=1 matmul would waste an MXU round-trip; a broadcast mul+add co-issues.
    xproj = x_ref[...] * wih_ref[...] + b_ref[...]        # (seq*bp, hidden)

    whh = whh_ref[...]
    h = h0_ref[...]                                       # carried in vregs

    # (2) Fully unrolled recurrence (seq is static). Per step only one
    #     (bp,hid)x(hid,hid) MXU op + one tanh remain on the serial chain.
    #     bp is a full sublane group, so the xproj slice and the h_all store are
    #     tile-aligned (no masked partial stores, no cross-step tile sharing).
    for t in range(seq):
        lo = t * bp
        pre = xproj[lo:lo + bp, :] + jnp.dot(
            h, whh, preferred_element_type=jnp.float32)
        h = jnp.tanh(pre)                                 # nn.RNN default nonlinearity
        h_all_ref[lo:lo + bp, :] = h

    hfin_ref[...] = h

    # (3) FC head over all timesteps in one MXU matmul; wfc is lane-padded to 128
    #     so the output store is an unmasked full-lane vst (column 0 is the real
    #     output; the wrapper slices it).
    out_ref[...] = (jnp.dot(h_all_ref[...], wfc_ref[...],
                            preferred_element_type=jnp.float32)
                    + bfc_ref[...])


def rnn_forward(x, hidden, params):
    """x: (batch, seq, input_size) batch-first; hidden: (1, batch, hidden_dim)."""
    wih, whh, b_ih, b_hh, wfc, bfc = params
    batch, seq, in_sz = x.shape
    hid = wih.shape[0]
    out_sz = wfc.shape[0]

    bp = ((batch + 7) // 8) * 8                                # pad batch to sublane group

    # Glue: time-major, zero-pad batch to bp, pre-transpose weights, fuse biases,
    # lane-pad the FC weight/bias to OUT_LANES.
    x_tm = jnp.transpose(x, (1, 0, 2)).astype(jnp.float32)     # (seq, batch, in)
    x_tm = jnp.pad(x_tm, ((0, 0), (0, bp - batch), (0, 0)))    # (seq, bp, in)
    x_tm = x_tm.reshape(seq * bp, in_sz)                       # row = t*bp + b

    h0 = hidden[0].astype(jnp.float32)                         # (batch, hidden)
    h0 = jnp.pad(h0, ((0, bp - batch), (0, 0)))                # (bp, hidden), pad rows = 0

    wih_t = wih.T.astype(jnp.float32)                          # (in, hidden)
    whh_t = whh.T.astype(jnp.float32)                          # (hidden, hidden)
    b2d = (b_ih + b_hh).reshape(1, hid).astype(jnp.float32)    # (1, hidden)

    wfc_t = wfc.T.astype(jnp.float32)                          # (hidden, out)
    wfc_pad = jnp.pad(wfc_t, ((0, 0), (0, OUT_LANES - out_sz)))   # (hidden, 128)
    bfc_pad = jnp.pad(bfc.reshape(1, out_sz).astype(jnp.float32),
                      ((0, 0), (0, OUT_LANES - out_sz)))          # (1, 128)

    grid_spec = pltpu.PrefetchScalarGridSpec(
        num_scalar_prefetch=0,
        grid=(1,),
        in_specs=[
            pl.BlockSpec((seq * bp, in_sz), lambda i: (0, 0)),
            pl.BlockSpec((bp, hid), lambda i: (0, 0)),
            pl.BlockSpec((in_sz, hid), lambda i: (0, 0)),
            pl.BlockSpec((hid, hid), lambda i: (0, 0)),
            pl.BlockSpec((1, hid), lambda i: (0, 0)),
            pl.BlockSpec((hid, OUT_LANES), lambda i: (0, 0)),
            pl.BlockSpec((1, OUT_LANES), lambda i: (0, 0)),
        ],
        out_specs=[
            pl.BlockSpec((seq * bp, OUT_LANES), lambda i: (0, 0)),
            pl.BlockSpec((bp, hid), lambda i: (0, 0)),
        ],
        scratch_shapes=[pltpu.VMEM((seq * bp, hid), jnp.float32)],
    )

    out_pad, h_fin_pad = pl.pallas_call(
        rnn_kernel,
        grid_spec=grid_spec,
        out_shape=(
            jax.ShapeDtypeStruct((seq * bp, OUT_LANES), jnp.float32),
            jax.ShapeDtypeStruct((bp, hid), jnp.float32),
        ),
        compiler_params=pltpu.CompilerParams(
            dimension_semantics=("arbitrary",)),
    )(x_tm, h0, wih_t, whh_t, b2d, wfc_pad, bfc_pad)

    # Drop lane padding (keep real output column(s)) and batch padding, then
    # reorder back to PyTorch semantics: r_out.view(-1, H) flattens (batch, seq).
    out_tm = out_pad[:, :out_sz].reshape(seq, bp, out_sz)[:, :batch, :]
    output = jnp.transpose(out_tm, (1, 0, 2)).reshape(-1, out_sz)  # (batch*seq, out)
    hidden_out = h_fin_pad[:batch][None]                           # (1, batch, hidden)
    return output, hidden_out


def reference_forward(x, hidden, params):
    """Pure-JAX reference matching PyTorch nn.RNN + Linear semantics."""
    wih, whh, b_ih, b_hh, wfc, bfc = params
    h = hidden[0]

    def step(h, x_t):
        h_new = jnp.tanh(x_t @ wih.T + b_ih + h @ whh.T + b_hh)
        return h_new, h_new

    h_fin, r_out = lax.scan(step, h, jnp.transpose(x, (1, 0, 2)))
    r_out = jnp.transpose(r_out, (1, 0, 2)).reshape(-1, wih.shape[0])
    return r_out @ wfc.T + bfc, h_fin[None]


def init_params(key):
    """Deterministic parameter init with PyTorch nn.RNN / nn.Linear shapes."""
    ks = jax.random.split(key, 6)
    k_rnn = 1.0 / np.sqrt(hidden_dim)
    wih = jax.random.uniform(ks[0], (hidden_dim, input_size), jnp.float32, -k_rnn, k_rnn)
    whh = jax.random.uniform(ks[1], (hidden_dim, hidden_dim), jnp.float32, -k_rnn, k_rnn)
    b_ih = jax.random.uniform(ks[2], (hidden_dim,), jnp.float32, -k_rnn, k_rnn)
    b_hh = jax.random.uniform(ks[3], (hidden_dim,), jnp.float32, -k_rnn, k_rnn)
    wfc = jax.random.uniform(ks[4], (output_size, hidden_dim), jnp.float32, -k_rnn, k_rnn)
    bfc = jax.random.uniform(ks[5], (output_size,), jnp.float32, -k_rnn, k_rnn)
    return wih, whh, b_ih, b_hh, wfc, bfc


if __name__ == "__main__":
    batch = 2
    key = jax.random.PRNGKey(0)
    k_p, k_x = jax.random.split(key)
    params = init_params(k_p)

    # Inputs analogous to the module's sin-wave data: (batch, seq_len, input_size)
    time_steps = np.linspace(0, np.pi, seq_len + 1)
    base = jnp.asarray(np.sin(time_steps)[:-1], dtype=jnp.float32)       # (seq_len,)
    x = jnp.stack([base, base * 0.5], axis=0)[..., None]                 # (2, 20, 1)
    x = x + 0.01 * jax.random.normal(k_x, x.shape, jnp.float32)
    hidden = jnp.zeros((n_layers, batch, hidden_dim), jnp.float32)

    out, h_out = rnn_forward(x, hidden, params)
    jax.block_until_ready((out, h_out))

    ref_out, ref_h = reference_forward(x, hidden, params)
    assert out.shape == (batch * seq_len, output_size)
    assert h_out.shape == (n_layers, batch, hidden_dim)
    np.testing.assert_allclose(np.asarray(out), np.asarray(ref_out), atol=1e-4, rtol=1e-4)
    np.testing.assert_allclose(np.asarray(h_out), np.asarray(ref_h), atol=1e-4, rtol=1e-4)

    print("KERNEL_OK")
</pallas_src>

<mosaic_0001>
module attributes {stable_mosaic.version = 11 : i64} {
  func.func @rnn_kernel(%arg0: i32, %arg1: memref<160x1xf32, #tpu.memory_space<vmem>>, %arg2: memref<8x32xf32, #tpu.memory_space<vmem>>, %arg3: memref<1x32xf32, #tpu.memory_space<vmem>>, %arg4: memref<32x32xf32, #tpu.memory_space<vmem>>, %arg5: memref<1x32xf32, #tpu.memory_space<vmem>>, %arg6: memref<32x128xf32, #tpu.memory_space<vmem>>, %arg7: memref<1x128xf32, #tpu.memory_space<vmem>>, %arg8: memref<160x128xf32, #tpu.memory_space<vmem>>, %arg9: memref<8x32xf32, #tpu.memory_space<vmem>>, %arg10: memref<160x32xf32, #tpu.memory_space<vmem>>) attributes {dimension_semantics = [#tpu.dimension_semantics<arbitrary>], iteration_bounds = array<i64: 1>, scalar_prefetch = 0 : i64, scratch_operands = 1 : i64, tpu.core_type = #tpu.core_type<tc>, window_params = [{pipeline_mode = #tpu.pipeline_mode<synchronous>, transform_indices = @transform_0, window_bounds = array<i64: 160, 1>}, {pipeline_mode = #tpu.pipeline_mode<synchronous>, transform_indices = @transform_1, window_bounds = array<i64: 8, 32>}, {pipeline_mode = #tpu.pipeline_mode<synchronous>, transform_indices = @transform_2, window_bounds = array<i64: 1, 32>}, {pipeline_mode = #tpu.pipeline_mode<synchronous>, transform_indices = @transform_3, window_bounds = array<i64: 32, 32>}, {pipeline_mode = #tpu.pipeline_mode<synchronous>, transform_indices = @transform_4, window_bounds = array<i64: 1, 32>}, {pipeline_mode = #tpu.pipeline_mode<synchronous>, transform_indices = @transform_5, window_bounds = array<i64: 32, 128>}, {pipeline_mode = #tpu.pipeline_mode<synchronous>, transform_indices = @transform_6, window_bounds = array<i64: 1, 128>}, {pipeline_mode = #tpu.pipeline_mode<synchronous>, transform_indices = @transform_7, window_bounds = array<i64: 160, 128>}, {pipeline_mode = #tpu.pipeline_mode<synchronous>, transform_indices = @transform_8, window_bounds = array<i64: 8, 32>}]} {
    %c0 = arith.constant 0 : index
    %c0_0 = arith.constant 0 : index
    %0 = vector.load %arg1[%c0, %c0_0] : memref<160x1xf32, #tpu.memory_space<vmem>>, vector<160x1xf32>
    %c0_1 = arith.constant 0 : index
    %c0_2 = arith.constant 0 : index
    %1 = vector.load %arg3[%c0_1, %c0_2] : memref<1x32xf32, #tpu.memory_space<vmem>>, vector<1x32xf32>
    %2 = vector.broadcast %0 : vector<160x1xf32> to vector<160x32xf32>
    %3 = vector.broadcast %1 : vector<1x32xf32> to vector<160x32xf32>
    %4 = arith.mulf %2, %3 : vector<160x32xf32>
    %c0_3 = arith.constant 0 : index
    %c0_4 = arith.constant 0 : index
    %5 = vector.load %arg5[%c0_3, %c0_4] : memref<1x32xf32, #tpu.memory_space<vmem>>, vector<1x32xf32>
    %6 = vector.broadcast %5 : vector<1x32xf32> to vector<160x32xf32>
    %7 = arith.addf %4, %6 : vector<160x32xf32>
    %c0_5 = arith.constant 0 : index
    %c0_6 = arith.constant 0 : index
    %8 = vector.load %arg4[%c0_5, %c0_6] : memref<32x32xf32, #tpu.memory_space<vmem>>, vector<32x32xf32>
    %c0_7 = arith.constant 0 : index
    %c0_8 = arith.constant 0 : index
    %9 = vector.load %arg2[%c0_7, %c0_8] : memref<8x32xf32, #tpu.memory_space<vmem>>, vector<8x32xf32>
    %10 = vector.extract_strided_slice %7 {offsets = [0, 0], sizes = [8, 32], strides = [1, 1]} : vector<160x32xf32> to vector<8x32xf32>
    %cst = arith.constant dense<0.000000e+00> : vector<8x32xf32>
    %11 = tpu.matmul %9, %8, %cst {dimension_numbers = #tpu.dot_dimension_numbers<[1], [0], [0], [1], [0, 0, 1, 1], [], []>} : vector<8x32xf32>, vector<32x32xf32>, vector<8x32xf32> -> vector<8x32xf32>
    %12 = arith.addf %10, %11 : vector<8x32xf32>
    %13 = math.tanh %12 : vector<8x32xf32>
    %c0_9 = arith.constant 0 : index
    %c0_10 = arith.constant 0 : index
    %14 = vector.load %arg10[%c0_9, %c0_10] : memref<160x32xf32, #tpu.memory_space<vmem>>, vector<8x32xf32>
    tpu.vector_store %arg10[%c0_9, %c0_10], %13 {strides = array<i32>} : memref<160x32xf32, #tpu.memory_space<vmem>>, vector<8x32xf32>,
    %15 = vector.extract_strided_slice %7 {offsets = [8, 0], sizes = [8, 32], strides = [1, 1]} : vector<160x32xf32> to vector<8x32xf32>
    %cst_11 = arith.constant dense<0.000000e+00> : vector<8x32xf32>
    %16 = tpu.matmul %13, %8, %cst_11 {dimension_numbers = #tpu.dot_dimension_numbers<[1], [0], [0], [1], [0, 0, 1, 1], [], []>} : vector<8x32xf32>, vector<32x32xf32>, vector<8x32xf32> -> vector<8x32xf32>
    %17 = arith.addf %15, %16 : vector<8x32xf32>
    %18 = math.tanh %17 : vector<8x32xf32>
    %c8 = arith.constant 8 : index
    %c0_12 = arith.constant 0 : index
    %19 = vector.load %arg10[%c8, %c0_12] : memref<160x32xf32, #tpu.memory_space<vmem>>, vector<8x32xf32>
    tpu.vector_store %arg10[%c8, %c0_12], %18 {strides = array<i32>} : memref<160x32xf32, #tpu.memory_space<vmem>>, vector<8x32xf32>,
    %20 = vector.extract_strided_slice %7 {offsets = [16, 0], sizes = [8, 32], strides = [1, 1]} : vector<160x32xf32> to vector<8x32xf32>
    %cst_13 = arith.constant dense<0.000000e+00> : vector<8x32xf32>
    %21 = tpu.matmul %18, %8, %cst_13 {dimension_numbers = #tpu.dot_dimension_numbers<[1], [0], [0], [1], [0, 0, 1, 1], [], []>} : vector<8x32xf32>, vector<32x32xf32>, vector<8x32xf32> -> vector<8x32xf32>
    %22 = arith.addf %20, %21 : vector<8x32xf32>
    %23 = math.tanh %22 : vector<8x32xf32>
    %c16 = arith.constant 16 : index
    %c0_14 = arith.constant 0 : index
    %24 = vector.load %arg10[%c16, %c0_14] : memref<160x32xf32, #tpu.memory_space<vmem>>, vector<8x32xf32>
    tpu.vector_store %arg10[%c16, %c0_14], %23 {strides = array<i32>} : memref<160x32xf32, #tpu.memory_space<vmem>>, vector<8x32xf32>,
    %25 = vector.extract_strided_slice %7 {offsets = [24, 0], sizes = [8, 32], strides = [1, 1]} : vector<160x32xf32> to vector<8x32xf32>
    %cst_15 = arith.constant dense<0.000000e+00> : vector<8x32xf32>
    %26 = tpu.matmul %23, %8, %cst_15 {dimension_numbers = #tpu.dot_dimension_numbers<[1], [0], [0], [1], [0, 0, 1, 1], [], []>} : vector<8x32xf32>, vector<32x32xf32>, vector<8x32xf32> -> vector<8x32xf32>
    %27 = arith.addf %25, %26 : vector<8x32xf32>
    %28 = math.tanh %27 : vector<8x32xf32>
    %c24 = arith.constant 24 : index
    %c0_16 = arith.constant 0 : index
    %29 = vector.load %arg10[%c24, %c0_16] : memref<160x32xf32, #tpu.memory_space<vmem>>, vector<8x32xf32>
    tpu.vector_store %arg10[%c24, %c0_16], %28 {strides = array<i32>} : memref<160x32xf32, #tpu.memory_space<vmem>>, vector<8x32xf32>,
    %30 = vector.extract_strided_slice %7 {offsets = [32, 0], sizes = [8, 32], strides = [1, 1]} : vector<160x32xf32> to vector<8x32xf32>
    %cst_17 = arith.constant dense<0.000000e+00> : vector<8x32xf32>
    %31 = tpu.matmul %28, %8, %cst_17 {dimension_numbers = #tpu.dot_dimension_numbers<[1], [0], [0], [1], [0, 0, 1, 1], [], []>} : vector<8x32xf32>, vector<32x32xf32>, vector<8x32xf32> -> vector<8x32xf32>
    %32 = arith.addf %30, %31 : vector<8x32xf32>
    %33 = math.tanh %32 : vector<8x32xf32>
    %c32 = arith.constant 32 : index
    %c0_18 = arith.constant 0 : index
    %34 = vector.load %arg10[%c32, %c0_18] : memref<160x32xf32, #tpu.memory_space<vmem>>, vector<8x32xf32>
    tpu.vector_store %arg10[%c32, %c0_18], %33 {strides = array<i32>} : memref<160x32xf32, #tpu.memory_space<vmem>>, vector<8x32xf32>,
    %35 = vector.extract_strided_slice %7 {offsets = [40, 0], sizes = [8, 32], strides = [1, 1]} : vector<160x32xf32> to vector<8x32xf32>
    %cst_19 = arith.constant dense<0.000000e+00> : vector<8x32xf32>
    %36 = tpu.matmul %33, %8, %cst_19 {dimension_numbers = #tpu.dot_dimension_numbers<[1], [0], [0], [1], [0, 0, 1, 1], [], []>} : vector<8x32xf32>, vector<32x32xf32>, vector<8x32xf32> -> vector<8x32xf32>
    %37 = arith.addf %35, %36 : vector<8x32xf32>
    %38 = math.tanh %37 : vector<8x32xf32>
    %c40 = arith.constant 40 : index
    %c0_20 = arith.constant 0 : index
    %39 = vector.load %arg10[%c40, %c0_20] : memref<160x32xf32, #tpu.memory_space<vmem>>, vector<8x32xf32>
    tpu.vector_store %arg10[%c40, %c0_20], %38 {strides = array<i32>} : memref<160x32xf32, #tpu.memory_space<vmem>>, vector<8x32xf32>,
    %40 = vector.extract_strided_slice %7 {offsets = [48, 0], sizes = [8, 32], strides = [1, 1]} : vector<160x32xf32> to vector<8x32xf32>
    %cst_21 = arith.constant dense<0.000000e+00> : vector<8x32xf32>
    %41 = tpu.matmul %38, %8, %cst_21 {dimension_numbers = #tpu.dot_dimension_numbers<[1], [0], [0], [1], [0, 0, 1, 1], [], []>} : vector<8x32xf32>, vector<32x32xf32>, vector<8x32xf32> -> vector<8x32xf32>
    %42 = arith.addf %40, %41 : vector<8x32xf32>
    %43 = math.tanh %42 : vector<8x32xf32>
    %c48 = arith.constant 48 : index
    %c0_22 = arith.constant 0 : index
    %44 = vector.load %arg10[%c48, %c0_22] : memref<160x32xf32, #tpu.memory_space<vmem>>, vector<8x32xf32>
    tpu.vector_store %arg10[%c48, %c0_22], %43 {strides = array<i32>} : memref<160x32xf32, #tpu.memory_space<vmem>>, vector<8x32xf32>,
    %45 = vector.extract_strided_slice %7 {offsets = [56, 0], sizes = [8, 32], strides = [1, 1]} : vector<160x32xf32> to vector<8x32xf32>
    %cst_23 = arith.constant dense<0.000000e+00> : vector<8x32xf32>
    %46 = tpu.matmul %43, %8, %cst_23 {dimension_numbers = #tpu.dot_dimension_numbers<[1], [0], [0], [1], [0, 0, 1, 1], [], []>} : vector<8x32xf32>, vector<32x32xf32>, vector<8x32xf32> -> vector<8x32xf32>
    %47 = arith.addf %45, %46 : vector<8x32xf32>
    %48 = math.tanh %47 : vector<8x32xf32>
    %c56 = arith.constant 56 : index
    %c0_24 = arith.constant 0 : index
    %49 = vector.load %arg10[%c56, %c0_24] : memref<160x32xf32, #tpu.memory_space<vmem>>, vector<8x32xf32>
    tpu.vector_store %arg10[%c56, %c0_24], %48 {strides = array<i32>} : memref<160x32xf32, #tpu.memory_space<vmem>>, vector<8x32xf32>,
    %50 = vector.extract_strided_slice %7 {offsets = [64, 0], sizes = [8, 32], strides = [1, 1]} : vector<160x32xf32> to vector<8x32xf32>
    %cst_25 = arith.constant dense<0.000000e+00> : vector<8x32xf32>
    %51 = tpu.matmul %48, %8, %cst_25 {dimension_numbers = #tpu.dot_dimension_numbers<[1], [0], [0], [1], [0, 0, 1, 1], [], []>} : vector<8x32xf32>, vector<32x32xf32>, vector<8x32xf32> -> vector<8x32xf32>
    %52 = arith.addf %50, %51 : vector<8x32xf32>
    %53 = math.tanh %52 : vector<8x32xf32>
    %c64 = arith.constant 64 : index
    %c0_26 = arith.constant 0 : index
    %54 = vector.load %arg10[%c64, %c0_26] : memref<160x32xf32, #tpu.memory_space<vmem>>, vector<8x32xf32>
    tpu.vector_store %arg10[%c64, %c0_26], %53 {strides = array<i32>} : memref<160x32xf32, #tpu.memory_space<vmem>>, vector<8x32xf32>,
    %55 = vector.extract_strided_slice %7 {offsets = [72, 0], sizes = [8, 32], strides = [1, 1]} : vector<160x32xf32> to vector<8x32xf32>
    %cst_27 = arith.constant dense<0.000000e+00> : vector<8x32xf32>
    %56 = tpu.matmul %53, %8, %cst_27 {dimension_numbers = #tpu.dot_dimension_numbers<[1], [0], [0], [1], [0, 0, 1, 1], [], []>} : vector<8x32xf32>, vector<32x32xf32>, vector<8x32xf32> -> vector<8x32xf32>
    %57 = arith.addf %55, %56 : vector<8x32xf32>
    %58 = math.tanh %57 : vector<8x32xf32>
    %c72 = arith.constant 72 : index
    %c0_28 = arith.constant 0 : index
    %59 = vector.load %arg10[%c72, %c0_28] : memref<160x32xf32, #tpu.memory_space<vmem>>, vector<8x32xf32>
    tpu.vector_store %arg10[%c72, %c0_28], %58 {strides = array<i32>} : memref<160x32xf32, #tpu.memory_space<vmem>>, vector<8x32xf32>,
    %60 = vector.extract_strided_slice %7 {offsets = [80, 0], sizes = [8, 32], strides = [1, 1]} : vector<160x32xf32> to vector<8x32xf32>
    %cst_29 = arith.constant dense<0.000000e+00> : vector<8x32xf32>
    %61 = tpu.matmul %58, %8, %cst_29 {dimension_numbers = #tpu.dot_dimension_numbers<[1], [0], [0], [1], [0, 0, 1, 1], [], []>} : vector<8x32xf32>, vector<32x32xf32>, vector<8x32xf32> -> vector<8x32xf32>
    %62 = arith.addf %60, %61 : vector<8x32xf32>
    %63 = math.tanh %62 : vector<8x32xf32>
    %c80 = arith.constant 80 : index
    %c0_30 = arith.constant 0 : index
    %64 = vector.load %arg10[%c80, %c0_30] : memref<160x32xf32, #tpu.memory_space<vmem>>, vector<8x32xf32>
    tpu.vector_store %arg10[%c80, %c0_30], %63 {strides = array<i32>} : memref<160x32xf32, #tpu.memory_space<vmem>>, vector<8x32xf32>,
    %65 = vector.extract_strided_slice %7 {offsets = [88, 0], sizes = [8, 32], strides = [1, 1]} : vector<160x32xf32> to vector<8x32xf32>
    %cst_31 = arith.constant dense<0.000000e+00> : vector<8x32xf32>
    %66 = tpu.matmul %63, %8, %cst_31 {dimension_numbers = #tpu.dot_dimension_numbers<[1], [0], [0], [1], [0, 0, 1, 1], [], []>} : vector<8x32xf32>, vector<32x32xf32>, vector<8x32xf32> -> vector<8x32xf32>
    %67 = arith.addf %65, %66 : vector<8x32xf32>
    %68 = math.tanh %67 : vector<8x32xf32>
    %c88 = arith.constant 88 : index
    %c0_32 = arith.constant 0 : index
    %69 = vector.load %arg10[%c88, %c0_32] : memref<160x32xf32, #tpu.memory_space<vmem>>, vector<8x32xf32>
    tpu.vector_store %arg10[%c88, %c0_32], %68 {strides = array<i32>} : memref<160x32xf32, #tpu.memory_space<vmem>>, vector<8x32xf32>,
    %70 = vector.extract_strided_slice %7 {offsets = [96, 0], sizes = [8, 32], strides = [1, 1]} : vector<160x32xf32> to vector<8x32xf32>
    %cst_33 = arith.constant dense<0.000000e+00> : vector<8x32xf32>
    %71 = tpu.matmul %68, %8, %cst_33 {dimension_numbers = #tpu.dot_dimension_numbers<[1], [0], [0], [1], [0, 0, 1, 1], [], []>} : vector<8x32xf32>, vector<32x32xf32>, vector<8x32xf32> -> vector<8x32xf32>
    %72 = arith.addf %70, %71 : vector<8x32xf32>
    %73 = math.tanh %72 : vector<8x32xf32>
    %c96 = arith.constant 96 : index
    %c0_34 = arith.constant 0 : index
    %74 = vector.load %arg10[%c96, %c0_34] : memref<160x32xf32, #tpu.memory_space<vmem>>, vector<8x32xf32>
    tpu.vector_store %arg10[%c96, %c0_34], %73 {strides = array<i32>} : memref<160x32xf32, #tpu.memory_space<vmem>>, vector<8x32xf32>,
    %75 = vector.extract_strided_slice %7 {offsets = [104, 0], sizes = [8, 32], strides = [1, 1]} : vector<160x32xf32> to vector<8x32xf32>
    %cst_35 = arith.constant dense<0.000000e+00> : vector<8x32xf32>
    %76 = tpu.matmul %73, %8, %cst_35 {dimension_numbers = #tpu.dot_dimension_numbers<[1], [0], [0], [1], [0, 0, 1, 1], [], []>} : vector<8x32xf32>, vector<32x32xf32>, vector<8x32xf32> -> vector<8x32xf32>
    %77 = arith.addf %75, %76 : vector<8x32xf32>
    %78 = math.tanh %77 : vector<8x32xf32>
    %c104 = arith.constant 104 : index
    %c0_36 = arith.constant 0 : index
    %79 = vector.load %arg10[%c104, %c0_36] : memref<160x32xf32, #tpu.memory_space<vmem>>, vector<8x32xf32>
    tpu.vector_store %arg10[%c104, %c0_36], %78 {strides = array<i32>} : memref<160x32xf32, #tpu.memory_space<vmem>>, vector<8x32xf32>,
    %80 = vector.extract_strided_slice %7 {offsets = [112, 0], sizes = [8, 32], strides = [1, 1]} : vector<160x32xf32> to vector<8x32xf32>
    %cst_37 = arith.constant dense<0.000000e+00> : vector<8x32xf32>
    %81 = tpu.matmul %78, %8, %cst_37 {dimension_numbers = #tpu.dot_dimension_numbers<[1], [0], [0], [1], [0, 0, 1, 1], [], []>} : vector<8x32xf32>, vector<32x32xf32>, vector<8x32xf32> -> vector<8x32xf32>
    %82 = arith.addf %80, %81 : vector<8x32xf32>
    %83 = math.tanh %82 : vector<8x32xf32>
    %c112 = arith.constant 112 : index
    %c0_38 = arith.constant 0 : index
    %84 = vector.load %arg10[%c112, %c0_38] : memref<160x32xf32, #tpu.memory_space<vmem>>, vector<8x32xf32>
    tpu.vector_store %arg10[%c112, %c0_38], %83 {strides = array<i32>} : memref<160x32xf32, #tpu.memory_space<vmem>>, vector<8x32xf32>,
    %85 = vector.extract_strided_slice %7 {offsets = [120, 0], sizes = [8, 32], strides = [1, 1]} : vector<160x32xf32> to vector<8x32xf32>
    %cst_39 = arith.constant dense<0.000000e+00> : vector<8x32xf32>
    %86 = tpu.matmul %83, %8, %cst_39 {dimension_numbers = #tpu.dot_dimension_numbers<[1], [0], [0], [1], [0, 0, 1, 1], [], []>} : vector<8x32xf32>, vector<32x32xf32>, vector<8x32xf32> -> vector<8x32xf32>
    %87 = arith.addf %85, %86 : vector<8x32xf32>
    %88 = math.tanh %87 : vector<8x32xf32>
    %c120 = arith.constant 120 : index
    %c0_40 = arith.constant 0 : index
    %89 = vector.load %arg10[%c120, %c0_40] : memref<160x32xf32, #tpu.memory_space<vmem>>, vector<8x32xf32>
    tpu.vector_store %arg10[%c120, %c0_40], %88 {strides = array<i32>} : memref<160x32xf32, #tpu.memory_space<vmem>>, vector<8x32xf32>,
    %90 = vector.extract_strided_slice %7 {offsets = [128, 0], sizes = [8, 32], strides = [1, 1]} : vector<160x32xf32> to vector<8x32xf32>
    %cst_41 = arith.constant dense<0.000000e+00> : vector<8x32xf32>
    %91 = tpu.matmul %88, %8, %cst_41 {dimension_numbers = #tpu.dot_dimension_numbers<[1], [0], [0], [1], [0, 0, 1, 1], [], []>} : vector<8x32xf32>, vector<32x32xf32>, vector<8x32xf32> -> vector<8x32xf32>
    %92 = arith.addf %90, %91 : vector<8x32xf32>
    %93 = math.tanh %92 : vector<8x32xf32>
    %c128 = arith.constant 128 : index
    %c0_42 = arith.constant 0 : index
    %94 = vector.load %arg10[%c128, %c0_42] : memref<160x32xf32, #tpu.memory_space<vmem>>, vector<8x32xf32>
    tpu.vector_store %arg10[%c128, %c0_42], %93 {strides = array<i32>} : memref<160x32xf32, #tpu.memory_space<vmem>>, vector<8x32xf32>,
    %95 = vector.extract_strided_slice %7 {offsets = [136, 0], sizes = [8, 32], strides = [1, 1]} : vector<160x32xf32> to vector<8x32xf32>
    %cst_43 = arith.constant dense<0.000000e+00> : vector<8x32xf32>
    %96 = tpu.matmul %93, %8, %cst_43 {dimension_numbers = #tpu.dot_dimension_numbers<[1], [0], [0], [1], [0, 0, 1, 1], [], []>} : vector<8x32xf32>, vector<32x32xf32>, vector<8x32xf32> -> vector<8x32xf32>
    %97 = arith.addf %95, %96 : vector<8x32xf32>
    %98 = math.tanh %97 : vector<8x32xf32>
    %c136 = arith.constant 136 : index
    %c0_44 = arith.constant 0 : index
    %99 = vector.load %arg10[%c136, %c0_44] : memref<160x32xf32, #tpu.memory_space<vmem>>, vector<8x32xf32>
    tpu.vector_store %arg10[%c136, %c0_44], %98 {strides = array<i32>} : memref<160x32xf32, #tpu.memory_space<vmem>>, vector<8x32xf32>,
    %100 = vector.extract_strided_slice %7 {offsets = [144, 0], sizes = [8, 32], strides = [1, 1]} : vector<160x32xf32> to vector<8x32xf32>
    %cst_45 = arith.constant dense<0.000000e+00> : vector<8x32xf32>
    %101 = tpu.matmul %98, %8, %cst_45 {dimension_numbers = #tpu.dot_dimension_numbers<[1], [0], [0], [1], [0, 0, 1, 1], [], []>} : vector<8x32xf32>, vector<32x32xf32>, vector<8x32xf32> -> vector<8x32xf32>
    %102 = arith.addf %100, %101 : vector<8x32xf32>
    %103 = math.tanh %102 : vector<8x32xf32>
    %c144 = arith.constant 144 : index
    %c0_46 = arith.constant 0 : index
    %104 = vector.load %arg10[%c144, %c0_46] : memref<160x32xf32, #tpu.memory_space<vmem>>, vector<8x32xf32>
    tpu.vector_store %arg10[%c144, %c0_46], %103 {strides = array<i32>} : memref<160x32xf32, #tpu.memory_space<vmem>>, vector<8x32xf32>,
    %105 = vector.extract_strided_slice %7 {offsets = [152, 0], sizes = [8, 32], strides = [1, 1]} : vector<160x32xf32> to vector<8x32xf32>
    %cst_47 = arith.constant dense<0.000000e+00> : vector<8x32xf32>
    %106 = tpu.matmul %103, %8, %cst_47 {dimension_numbers = #tpu.dot_dimension_numbers<[1], [0], [0], [1], [0, 0, 1, 1], [], []>} : vector<8x32xf32>, vector<32x32xf32>, vector<8x32xf32> -> vector<8x32xf32>
    %107 = arith.addf %105, %106 : vector<8x32xf32>
    %108 = math.tanh %107 : vector<8x32xf32>
    %c152 = arith.constant 152 : index
    %c0_48 = arith.constant 0 : index
    %109 = vector.load %arg10[%c152, %c0_48] : memref<160x32xf32, #tpu.memory_space<vmem>>, vector<8x32xf32>
    tpu.vector_store %arg10[%c152, %c0_48], %108 {strides = array<i32>} : memref<160x32xf32, #tpu.memory_space<vmem>>, vector<8x32xf32>,
    %c0_49 = arith.constant 0 : index
    %c0_50 = arith.constant 0 : index
    %110 = vector.load %arg9[%c0_49, %c0_50] : memref<8x32xf32, #tpu.memory_space<vmem>>, vector<8x32xf32>
    tpu.vector_store %arg9[%c0_49, %c0_50], %108 {strides = array<i32>} : memref<8x32xf32, #tpu.memory_space<vmem>>, vector<8x32xf32>,
    %c0_51 = arith.constant 0 : index
    %c0_52 = arith.constant 0 : index
    %111 = vector.load %arg10[%c0_51, %c0_52] : memref<160x32xf32, #tpu.memory_space<vmem>>, vector<160x32xf32>
    %c0_53 = arith.constant 0 : index
    %c0_54 = arith.constant 0 : index
    %112 = vector.load %arg6[%c0_53, %c0_54] : memref<32x128xf32, #tpu.memory_space<vmem>>, vector<32x128xf32>
    %cst_55 = arith.constant dense<0.000000e+00> : vector<160x128xf32>
    %113 = tpu.matmul %111, %112, %cst_55 {dimension_numbers = #tpu.dot_dimension_numbers<[1], [0], [0], [1], [0, 0, 1, 1], [], []>} : vector<160x32xf32>, vector<32x128xf32>, vector<160x128xf32> -> vector<160x128xf32>
    %c0_56 = arith.constant 0 : index
    %c0_57 = arith.constant 0 : index
    %114 = vector.load %arg7[%c0_56, %c0_57] : memref<1x128xf32, #tpu.memory_space<vmem>>, vector<1x128xf32>
    %115 = vector.broadcast %114 : vector<1x128xf32> to vector<160x128xf32>
    %116 = arith.addf %113, %115 : vector<160x128xf32>
    %c0_58 = arith.constant 0 : index
    %c0_59 = arith.constant 0 : index
    %117 = vector.load %arg8[%c0_58, %c0_59] : memref<160x128xf32, #tpu.memory_space<vmem>>, vector<160x128xf32>
    tpu.vector_store %arg8[%c0_58, %c0_59], %116 {strides = array<i32>} : memref<160x128xf32, #tpu.memory_space<vmem>>, vector<160x128xf32>,
    return
  }
  func.func @transform_0(%arg0: i32) -> (i32, i32) {
    %c0_i32 = arith.constant 0 : i32
    %c0_i32_0 = arith.constant 0 : i32
    %c0_i32_1 = arith.constant 0 : i32
    return %c0_i32, %c0_i32_0 : i32, i32
  }
  func.func @transform_1(%arg0: i32) -> (i32, i32) {
    %c0_i32 = arith.constant 0 : i32
    %c0_i32_0 = arith.constant 0 : i32
    %c0_i32_1 = arith.constant 0 : i32
    return %c0_i32, %c0_i32_0 : i32, i32
  }
  func.func @transform_2(%arg0: i32) -> (i32, i32) {
    %c0_i32 = arith.constant 0 : i32
    %c0_i32_0 = arith.constant 0 : i32
    %c0_i32_1 = arith.constant 0 : i32
    return %c0_i32, %c0_i32_0 : i32, i32
  }
  func.func @transform_3(%arg0: i32) -> (i32, i32) {
    %c0_i32 = arith.constant 0 : i32
    %c0_i32_0 = arith.constant 0 : i32
    %c0_i32_1 = arith.constant 0 : i32
    return %c0_i32, %c0_i32_0 : i32, i32
  }
  func.func @transform_4(%arg0: i32) -> (i32, i32) {
    %c0_i32 = arith.constant 0 : i32
    %c0_i32_0 = arith.constant 0 : i32
    %c0_i32_1 = arith.constant 0 : i32
    return %c0_i32, %c0_i32_0 : i32, i32
  }
  func.func @transform_5(%arg0: i32) -> (i32, i32) {
    %c0_i32 = arith.constant 0 : i32
    %c0_i32_0 = arith.constant 0 : i32
    %c0_i32_1 = arith.constant 0 : i32
    return %c0_i32, %c0_i32_0 : i32, i32
  }
  func.func @transform_6(%arg0: i32) -> (i32, i32) {
    %c0_i32 = arith.constant 0 : i32
    %c0_i32_0 = arith.constant 0 : i32
    %c0_i32_1 = arith.constant 0 : i32
    return %c0_i32, %c0_i32_0 : i32, i32
  }
  func.func @transform_7(%arg0: i32) -> (i32, i32) {
    %c0_i32 = arith.constant 0 : i32
    %c0_i32_0 = arith.constant 0 : i32
    %c0_i32_1 = arith.constant 0 : i32
    return %c0_i32, %c0_i32_0 : i32, i32
  }
  func.func @transform_8(%arg0: i32) -> (i32, i32) {
    %c0_i32 = arith.constant 0 : i32
    %c0_i32_0 = arith.constant 0 : i32
    %c0_i32_1 = arith.constant 0 : i32
    return %c0_i32, %c0_i32_0 : i32, i32
  }
}

</mosaic_0001>

<bundles_post_ra>
// kernel: tpu_custom_call.1
= control target key start
LH: loop header
LB: loop body
LE: loop exit
PB: predicated region body
PF: predicated region fallthrough
CT: control target
= control target key end

     0   :  { %14 = vsyncpa [#allocation4], 0  ;;  %v2692_v3 = vmov 0.0|0.0   ;;  %vm2693_vm0 = vmmov 0   ;;  %v2694_v6 = vmov 0.0   ;;  %v2695_v8 = vmov 0   ;;  %s3116_s0 = inlined_call_operand.vmem [shape: f32[160,1], index: 0, kind: input, shape index: {}]   ;;  %s3117_s1 = inlined_call_operand.vmem [shape: f32[8,32], index: 1, kind: input, shape index: {}]   ;;  %s3118_s2 = inlined_call_operand.vmem [shape: f32[1,32], index: 2, kind: input, shape index: {}]   ;;  %s3119_s3 = inlined_call_operand.vmem [shape: f32[32,32], index: 3, kind: input, shape index: {}]   ;;  %s3120_s4 = inlined_call_operand.vmem [shape: f32[1,32], index: 4, kind: input, shape index: {}]   ;;  %s3121_s5 = inlined_call_operand.vmem [shape: f32[32,128], index: 5, kind: input, shape index: {}]   ;;  %s3122_s6 = inlined_call_operand.vmem [shape: f32[1,128], index: 6, kind: input, shape index: {}]   ;;  %s3123_s7 = inlined_call_operand.hbm [shape: f32[160,128], index: 7, kind: output, shape index: {0}]   ;;  %s3124_s8 = inlined_call_operand.hbm [shape: f32[8,32], index: 8, kind: output, shape index: {1}]  }
   0x1   :  { %v204_v0 = vld [vmem:[%s3119_s3] sm:$0xff]  ;;  %v205_v1 = vld [vmem:[%s3119_s3 + $0x8] sm:$0xff]  ;;  %v206_v2 = vld [vmem:[%s3119_s3 + $0x10] sm:$0xff]  ;;  %2462 = vmatprep.subr.bf16.mxu0 %v2692_v3  ;;  %2212 = vmatprep.mubr.msk.f32.mxu0 %vm2693_vm0, %v2694_v6 }
   0x2   :  { %v2755_v4 = vpack.c.bf16 %v205_v1, %v204_v0  ;;  %v207_v5 = vld [vmem:[%s3119_s3 + $0x18] sm:$0xff]  ;;  %v30_v7 = vld [vmem:[%s3116_s0] sm:$0xff]  ;;  %2602 = vset.pattern.permute.xlu0 %v2695_v8  ;;  %2468 = vmatprep.subr.bf16.mxu1 %v2692_v3  ;;  %v31_v10 = vld [vmem:[%s3116_s0 + $0x8] sm:$0xff] }
   0x3   :  { %v2767_v9 = vpack.c.bf16 %v207_v5, %v206_v2  ;;  %53 = vperm.xlu0 %2602, %v30_v7   ;;  %2223 = vmatprep.mubr.msk.f32.mxu1 %vm2693_vm0, %v2694_v6 }
   0x4   :  { %2464 = vmatpush3.bf16.msra.mxu0 %v2755_v4  ;;  %2470 = vmatpush3.bf16.msra.mxu1 %v2755_v4 }
   0x5   :  { %2465 = vmatprep.subr.bf16.mxu0 %v2692_v3  ;;  %2471 = vmatprep.subr.bf16.mxu1 %v2692_v3 }
   0x6   :  { %15 = vsyncpa [#allocation6], 0  ;;  %2603 = vset.pattern.permute.xlu1 %v2695_v8  ;;  %v208_v11 = vld [vmem:[%s3117_s1] sm:$0xff]  ;;  %vm209_vm1 = vcmask 261120   ;;  %v36_v13 = vld [vmem:[%s3116_s0 + $0x30] sm:$0xff] }
   0x7   :  { %58 = vperm.xlu0 %2602, %v31_v10   ;;  %v34_v12 = vld [vmem:[%s3116_s0 + $0x20] sm:$0xff]  ;;  %v40_v15 = vld [vmem:[%s3116_s0 + $0x50] sm:$0xff]  ;;  %v33_v30 = vld [vmem:[%s3116_s0 + $0x18] sm:$0xff] }
   0x8   :  { %2467 = vmatpush3.bf16.msra.mxu0 %v2767_v9  ;;  %2473 = vmatpush3.bf16.msra.mxu1 %v2767_v9  ;;  %v38_v14 = vld [vmem:[%s3116_s0 + $0x40] sm:$0xff]  ;;  %v44_v17 = vld [vmem:[%s3116_s0 + $0x70] sm:$0xff]  ;;  %v35_v31 = vld [vmem:[%s3116_s0 + $0x28] sm:$0xff] }
   0x9   :  { %2474 = vmatprep.subr.bf16.mxu0 %v2692_v3  ;;  %2480 = vmatprep.subr.bf16.mxu1 %v2692_v3  ;;  %v42_v16 = vld [vmem:[%s3116_s0 + $0x60] sm:$0xff]  ;;  %v48_v19 = vld [vmem:[%s3116_s0 + $0x90] sm:$0xff]  ;;  %v37_v32 = vld [vmem:[%s3116_s0 + $0x38] sm:$0xff] }
   0xa   :  { %v46_v18 = vld [vmem:[%s3116_s0 + $0x80] sm:$0xff]  ;;  %v32_v29 = vld [vmem:[%s3116_s0 + $0x10] sm:$0xff]  ;;  %v39_v33 = vld [vmem:[%s3116_s0 + $0x48] sm:$0xff] }
   0xb   :  { %2213 = vmatmul.mubr.msk.f32.vlgmr.msra.gmra.mrb[0].mxu0 %vm209_vm1, %v208_v11  ;;  %73 = vperm.xlu0 %2602, %v34_v12   ;;  %v2818_v20 = vld [vmem:[%s3118_s2] ss:$0 sm:$0xff]  ;;  %v41_v34 = vld [vmem:[%s3116_s0 + $0x58] sm:$0xff]  ;;  %v43_v35 = vld [vmem:[%s3116_s0 + $0x68] sm:$0xff] }
   0xc   :  { %2476 = vmatpush3.bf16.msra.mxu0 %v2755_v4  ;;  %2234 = vmatprep.mubr.msk.f32.mxu0 %vm2693_vm0, %v2694_v6  ;;  %v2824_v23 = vld [vmem:[%s3120_s4] ss:$0 sm:$0xff]  ;;  %v45_v36 = vld [vmem:[%s3116_s0 + $0x78] sm:$0xff]  ;;  %v47_v37 = vld [vmem:[%s3116_s0 + $0x88] sm:$0xff] }
   0xd   :  { %2477 = vmatprep.subr.bf16.mxu0 %v2692_v3  ;;  %63 = vperm.xlu1 %2603, %v32_v29   ;;  %v49_v38 = vld [vmem:[%s3116_s0 + $0x98] sm:$0xff] }
   0xf   :  { %83 = vperm.xlu0 %2602, %v36_v13  }
  0x10   :  { %2479 = vmatpush3.bf16.msra.mxu0 %v2767_v9 }
  0x11   :  { %2486 = vmatprep.subr.bf16.mxu0 %v2692_v3  ;;  %68 = vperm.xlu1 %2603, %v33_v30  }
  0x13   :  { %93 = vperm.xlu0 %2602, %v38_v14  }
  0x15   :  { %78 = vperm.xlu1 %2603, %v35_v31  }
  0x17   :  { %103 = vperm.xlu0 %2602, %v40_v15  }
  0x19   :  { %88 = vperm.xlu1 %2603, %v37_v32  }
  0x1b   :  { %113 = vperm.xlu0 %2602, %v42_v16  }
  0x1d   :  { %98 = vperm.xlu1 %2603, %v39_v33  }
  0x1f   :  { %123 = vperm.xlu0 %2602, %v44_v17  }
  0x21   :  { %108 = vperm.xlu1 %2603, %v41_v34  }
  0x23   :  { %133 = vperm.xlu0 %2602, %v46_v18  }
  0x25   :  { %118 = vperm.xlu1 %2603, %v43_v35  }
  0x27   :  { %143 = vperm.xlu0 %2602, %v48_v19  }
  0x29   :  { %128 = vperm.xlu1 %2603, %v45_v36  }
  0x2d   :  { %138 = vperm.xlu1 %2603, %v47_v37  }
  0x31   :  { %148 = vperm.xlu1 %2603, %v49_v38  }
  0x82   :  { %v54_v21 = vpop.permute.xlu0 %53 }
  0x83   :  { %v157_v22 = vmul.f32 %v2818_v20, %v54_v21 }
  0x85   :  { %v184_v24 = vadd.f32 %v2824_v23, %v157_v22 }
  0x86   :  { %v59_v39 = vpop.permute.xlu0 %58 }
  0x87   :  { %v158_v40 = vmul.f32 %v2818_v20, %v59_v39 }
  0x89   :  { %v185_v41 = vadd.f32 %v2824_v23, %v158_v40 }
  0x8a   :  { %v74_v60 = vpop.permute.xlu0 %73 }
  0x8b   :  { %v161_v61 = vmul.f32 %v2818_v20, %v74_v60 }
  0x8c   :  { %v64_v46 = vpop.permute.xlu1 %63 }
  0x8d   :  { %v159_v47 = vmul.f32 %v2818_v20, %v64_v46  ;;  %v188_v62 = vadd.f32 %v2824_v23, %v161_v61 }
  0x8e   :  { %v84_v14 = vpop.permute.xlu0 %83 }
  0x8f   :  { %v186_v48 = vadd.f32 %v2824_v23, %v159_v47  ;;  %v163_v15 = vmul.f32 %v2818_v20, %v84_v14 }
  0x90   :  { %v69_v53 = vpop.permute.xlu1 %68 }
  0x91   :  { %v160_v54 = vmul.f32 %v2818_v20, %v69_v53  ;;  %v190_v16 = vadd.f32 %v2824_v23, %v163_v15 }
  0x92   :  { %v94_v30 = vpop.permute.xlu0 %93 }
  0x93   :  { %v187_v55 = vadd.f32 %v2824_v23, %v160_v54  ;;  %v165_v31 = vmul.f32 %v2818_v20, %v94_v30 }
  0x94   :  { %v79_v5 = vpop.permute.xlu1 %78 }
  0x95   :  { %v162_v7 = vmul.f32 %v2818_v20, %v79_v5  ;;  %v192_v32 = vadd.f32 %v2824_v23, %v165_v31 }
  0x97   :  { %v189_v8 = vadd.f32 %v2824_v23, %v162_v7 }
  0x98   :  { %v89_v22 = vpop.permute.xlu1 %88 }
  0x9c   :  { %v99_v37 = vpop.permute.xlu1 %98 }
  0x9d   :  { %v166_v38 = vmul.f32 %v2818_v20, %v99_v37 }
  0x9f   :  { %v193_v39 = vadd.f32 %v2824_v23, %v166_v38 }
  0xde   :  { %v279_v25 = vpop.f32.mrb[0].mxu0 }
  0xdf   :  { %v283_v26 = vadd.f32 %v279_v25, %v184_v24  ;;  %v2214_v27 = vpop.f32.mrb[1].mxu0  ;;  %v164_v24 = vmul.f32 %v2818_v20, %v89_v22 }
  0xe1   :  { %2604 = vtanh.f32 %v283_v26  ;;  %v191_v25 = vadd.f32 %v2824_v23, %v164_v24 }
  0xeb   :  { %v2605_v28 = vpop.eup %2604 }
  0xec   :  { %285 = vst.msk [vmem:[#allocation2] sm:$0xff] %vm209_vm1, %v2605_v28  ;;  %2224 = vmatmul.mubr.msk.f32.vlgmr.msra.gmra.mrb[0].mxu1 %vm209_vm1, %v2605_v28 }
  0xed   :  { %2482 = vmatpush3.bf16.msra.mxu1 %v2755_v4  ;;  %2245 = vmatprep.mubr.msk.f32.mxu1 %vm2693_vm0, %v2694_v6 }
  0xee   :  { %2483 = vmatprep.subr.bf16.mxu1 %v2692_v3 }
  0xf1   :  { %2485 = vmatpush3.bf16.msra.mxu1 %v2767_v9 }
  0xf2   :  { %2492 = vmatprep.subr.bf16.mxu1 %v2692_v3 }
 0x1bf   :  { %v355_v42 = vpop.f32.mrb[0].mxu1 }
 0x1c0   :  { %v359_v43 = vadd.f32 %v355_v42, %v185_v41  ;;  %v2225_v44 = vpop.f32.mrb[1].mxu1 }
 0x1c1   :  { %v104_v44 = vpop.permute.xlu0 %103 }
 0x1c2   :  { %2606 = vtanh.f32 %v359_v43 }
 0x1cc   :  { %v2607_v45 = vpop.eup %2606 }
 0x1cd   :  { %361 = vst.msk [vmem:[#allocation2 + $0x8] sm:$0xff] %vm209_vm1, %v2607_v45  ;;  %2235 = vmatmul.mubr.msk.f32.vlgmr.msra.gmra.mrb[2].mxu0 %vm209_vm1, %v2607_v45  ;;  %v167_v45 = vmul.f32 %v2818_v20, %v104_v44  ;;  %v1731_v44 = vld [vmem:[#allocation2] sm:$0xff] }
 0x1ce   :  { %2488 = vmatpush3.bf16.msra.mxu0 %v2755_v4  ;;  %2256 = vmatprep.mubr.msk.f32.mxu0 %vm2693_vm0, %v2694_v6 }
 0x1cf   :  { %2489 = vmatprep.subr.bf16.mxu0 %v2692_v3  ;;  %v194_v46 = vadd.f32 %v2824_v23, %v167_v45 }
 0x1d2   :  { %2491 = vmatpush3.bf16.msra.mxu0 %v2767_v9 }
 0x1d3   :  { %2498 = vmatprep.subr.bf16.mxu0 %v2692_v3 }
 0x1d4   :  { %v1732_v45 = vld [vmem:[#allocation2 + $0x8] sm:$0xff] }
 0x2a0   :  { %v431_v49 = vpop.f32.mrb[2].mxu0 }
 0x2a1   :  { %v435_v50 = vadd.f32 %v431_v49, %v186_v48  ;;  %v2236_v51 = vpop.f32.mrb[3].mxu0 }
 0x2a2   :  { %v109_v51 = vpop.permute.xlu1 %108 }
 0x2a3   :  { %2608 = vtanh.f32 %v435_v50 }
 0x2ad   :  { %v2609_v52 = vpop.eup %2608 }
 0x2ae   :  { %437 = vst.msk [vmem:[#allocation2 + $0x10] sm:$0xff] %vm209_vm1, %v2609_v52  ;;  %2246 = vmatmul.mubr.msk.f32.vlgmr.msra.gmra.mrb[2].mxu1 %vm209_vm1, %v2609_v52  ;;  %v168_v52 = vmul.f32 %v2818_v20, %v109_v51 }
 0x2af   :  { %2494 = vmatpush3.bf16.msra.mxu1 %v2755_v4  ;;  %2267 = vmatprep.mubr.msk.f32.mxu1 %vm2693_vm0, %v2694_v6 }
 0x2b0   :  { %2495 = vmatprep.subr.bf16.mxu1 %v2692_v3  ;;  %v195_v53 = vadd.f32 %v2824_v23, %v168_v52 }
 0x2b3   :  { %2497 = vmatpush3.bf16.msra.mxu1 %v2767_v9 }
 0x2b4   :  { %2504 = vmatprep.subr.bf16.mxu1 %v2692_v3 }
 0x381   :  { %v507_v56 = vpop.f32.mrb[2].mxu1 }
 0x382   :  { %v511_v57 = vadd.f32 %v507_v56, %v187_v55  ;;  %v2247_v58 = vpop.f32.mrb[3].mxu1 }
 0x383   :  { %v114_v58 = vpop.permute.xlu0 %113 }
 0x384   :  { %2610 = vtanh.f32 %v511_v57 }
 0x38e   :  { %v2611_v59 = vpop.eup %2610 }
 0x38f   :  { %513 = vst.msk [vmem:[#allocation2 + $0x18] sm:$0xff] %vm209_vm1, %v2611_v59  ;;  %2257 = vmatmul.mubr.msk.f32.vlgmr.msra.gmra.mrb[4].mxu0 %vm209_vm1, %v2611_v59  ;;  %v169_v59 = vmul.f32 %v2818_v20, %v114_v58 }
 0x390   :  { %2500 = vmatpush3.bf16.msra.mxu0 %v2755_v4  ;;  %2278 = vmatprep.mubr.msk.f32.mxu0 %vm2693_vm0, %v2694_v6 }
 0x391   :  { %2501 = vmatprep.subr.bf16.mxu0 %v2692_v3  ;;  %v196_v60 = vadd.f32 %v2824_v23, %v169_v59 }
 0x394   :  { %2503 = vmatpush3.bf16.msra.mxu0 %v2767_v9 }
 0x395   :  { %2510 = vmatprep.subr.bf16.mxu0 %v2692_v3 }
 0x462   :  { %v583_v63 = vpop.f32.mrb[4].mxu0 }
 0x463   :  { %v587_v0 = vadd.f32 %v583_v63, %v188_v62  ;;  %v2258_v1 = vpop.f32.mrb[5].mxu0 }
 0x464   :  { %v119_v1 = vpop.permute.xlu1 %118 }
 0x465   :  { %2612 = vtanh.f32 %v587_v0 }
 0x46f   :  { %v2613_v2 = vpop.eup %2612 }
 0x470   :  { %589 = vst.msk [vmem:[#allocation2 + $0x20] sm:$0xff] %vm209_vm1, %v2613_v2  ;;  %2268 = vmatmul.mubr.msk.f32.vlgmr.msra.gmra.mrb[4].mxu1 %vm209_vm1, %v2613_v2  ;;  %v170_v2 = vmul.f32 %v2818_v20, %v119_v1 }
 0x471   :  { %2506 = vmatpush3.bf16.msra.mxu1 %v2755_v4  ;;  %2289 = vmatprep.mubr.msk.f32.mxu1 %vm2693_vm0, %v2694_v6 }
 0x472   :  { %2507 = vmatprep.subr.bf16.mxu1 %v2692_v3  ;;  %v197_v5 = vadd.f32 %v2824_v23, %v170_v2 }
 0x475   :  { %2509 = vmatpush3.bf16.msra.mxu1 %v2767_v9 }
 0x476   :  { %2516 = vmatprep.subr.bf16.mxu1 %v2692_v3 }
 0x543   :  { %v659_v10 = vpop.f32.mrb[4].mxu1 }
 0x544   :  { %v663_v11 = vadd.f32 %v659_v10, %v189_v8  ;;  %v2269_v12 = vpop.f32.mrb[5].mxu1 }
 0x545   :  { %v124_v12 = vpop.permute.xlu0 %123 }
 0x546   :  { %2614 = vtanh.f32 %v663_v11 }
 0x550   :  { %v2615_v13 = vpop.eup %2614 }
 0x551   :  { %665 = vst.msk [vmem:[#allocation2 + $0x28] sm:$0xff] %vm209_vm1, %v2615_v13  ;;  %2279 = vmatmul.mubr.msk.f32.vlgmr.msra.gmra.mrb[6].mxu0 %vm209_vm1, %v2615_v13  ;;  %v171_v13 = vmul.f32 %v2818_v20, %v124_v12 }
 0x552   :  { %2512 = vmatpush3.bf16.msra.mxu0 %v2755_v4  ;;  %2300 = vmatprep.mubr.msk.f32.mxu0 %vm2693_vm0, %v2694_v6 }
 0x553   :  { %2513 = vmatprep.subr.bf16.mxu0 %v2692_v3  ;;  %v198_v14 = vadd.f32 %v2824_v23, %v171_v13 }
 0x556   :  { %2515 = vmatpush3.bf16.msra.mxu0 %v2767_v9 }
 0x557   :  { %2522 = vmatprep.subr.bf16.mxu0 %v2692_v3 }
 0x624   :  { %v735_v17 = vpop.f32.mrb[6].mxu0 }
 0x625   :  { %v739_v18 = vadd.f32 %v735_v17, %v190_v16  ;;  %v2280_v19 = vpop.f32.mrb[7].mxu0 }
 0x626   :  { %v129_v19 = vpop.permute.xlu1 %128 }
 0x627   :  { %2616 = vtanh.f32 %v739_v18 }
 0x62a   :  { %v139_v38 = vpop.permute.xlu1 %138 }
 0x631   :  { %v2617_v21 = vpop.eup %2616 }
 0x632   :  { %741 = vst.msk [vmem:[#allocation2 + $0x30] sm:$0xff] %vm209_vm1, %v2617_v21  ;;  %2290 = vmatmul.mubr.msk.f32.vlgmr.msra.gmra.mrb[6].mxu1 %vm209_vm1, %v2617_v21  ;;  %v172_v21 = vmul.f32 %v2818_v20, %v129_v19 }
 0x633   :  { %2518 = vmatpush3.bf16.msra.mxu1 %v2755_v4  ;;  %2311 = vmatprep.mubr.msk.f32.mxu1 %vm2693_vm0, %v2694_v6 }
 0x634   :  { %2519 = vmatprep.subr.bf16.mxu1 %v2692_v3  ;;  %v199_v22 = vadd.f32 %v2824_v23, %v172_v21 }
 0x637   :  { %2521 = vmatpush3.bf16.msra.mxu1 %v2767_v9 }
 0x638   :  { %2528 = vmatprep.subr.bf16.mxu1 %v2692_v3 }
 0x705   :  { %v811_v26 = vpop.f32.mrb[6].mxu1 }
 0x706   :  { %v815_v27 = vadd.f32 %v811_v26, %v191_v25  ;;  %v2291_v28 = vpop.f32.mrb[7].mxu1 }
 0x707   :  { %v134_v28 = vpop.permute.xlu0 %133 }
 0x708   :  { %2618 = vtanh.f32 %v815_v27 }
 0x712   :  { %v2619_v29 = vpop.eup %2618 }
 0x713   :  { %817 = vst.msk [vmem:[#allocation2 + $0x38] sm:$0xff] %vm209_vm1, %v2619_v29  ;;  %2301 = vmatmul.mubr.msk.f32.vlgmr.msra.gmra.mrb[8].mxu0 %vm209_vm1, %v2619_v29  ;;  %v173_v29 = vmul.f32 %v2818_v20, %v134_v28 }
 0x714   :  { %2524 = vmatpush3.bf16.msra.mxu0 %v2755_v4  ;;  %2322 = vmatprep.mubr.msk.f32.mxu0 %vm2693_vm0, %v2694_v6 }
 0x715   :  { %2525 = vmatprep.subr.bf16.mxu0 %v2692_v3  ;;  %v200_v30 = vadd.f32 %v2824_v23, %v173_v29 }
 0x718   :  { %2527 = vmatpush3.bf16.msra.mxu0 %v2767_v9 }
 0x719   :  { %2534 = vmatprep.subr.bf16.mxu0 %v2692_v3 }
 0x71a   :  { %v1738_v51 = vld [vmem:[#allocation2 + $0x38] sm:$0xff] }
 0x7e6   :  { %v887_v33 = vpop.f32.mrb[8].mxu0 }
 0x7e7   :  { %v891_v34 = vadd.f32 %v887_v33, %v192_v32  ;;  %v2302_v35 = vpop.f32.mrb[9].mxu0 }
 0x7e8   :  { %v1751_v35 = vld [vmem:[%s3121_s5] sm:$0xff] }
 0x7e9   :  { %2620 = vtanh.f32 %v891_v34 }
 0x7f3   :  { %v2621_v36 = vpop.eup %2620 }
 0x7f4   :  { %893 = vst.msk [vmem:[#allocation2 + $0x40] sm:$0xff] %vm209_vm1, %v2621_v36  ;;  %2312 = vmatmul.mubr.msk.f32.vlgmr.msra.gmra.mrb[8].mxu1 %vm209_vm1, %v2621_v36  ;;  %v1752_v36 = vld [vmem:[%s3121_s5 + $0x8] sm:$0xff] }
 0x7f5   :  { %2530 = vmatpush3.bf16.msra.mxu1 %v2755_v4  ;;  %2333 = vmatprep.mubr.msk.f32.mxu1 %vm2693_vm0, %v2694_v6  ;;  %v2582_v37 = vpack.c.bf16 %v1752_v36, %v1751_v35 }
 0x7f6   :  { %2531 = vmatprep.subr.bf16.mxu1 %v2692_v3 }
 0x7f9   :  { %2533 = vmatpush3.bf16.msra.mxu1 %v2767_v9 }
 0x7fa   :  { %2540 = vmatprep.subr.bf16.mxu1 %v2692_v3 }
 0x7fb   :  { %v1739_v52 = vld [vmem:[#allocation2 + $0x40] sm:$0xff] }
 0x8c7   :  { %v963_v40 = vpop.f32.mrb[8].mxu1 }
 0x8c8   :  { %v967_v41 = vadd.f32 %v963_v40, %v193_v39  ;;  %v2313_v42 = vpop.f32.mrb[9].mxu1 }
 0x8ca   :  { %2622 = vtanh.f32 %v967_v41  ;;  %v1754_v41 = vld [vmem:[%s3121_s5 + $0x18] sm:$0xff] }
 0x8d4   :  { %v2623_v43 = vpop.eup %2622 }
 0x8d5   :  { %969 = vst.msk [vmem:[#allocation2 + $0x48] sm:$0xff] %vm209_vm1, %v2623_v43  ;;  %2323 = vmatmul.mubr.msk.f32.vlgmr.msra.gmra.mrb[10].mxu0 %vm209_vm1, %v2623_v43 }
 0x8d6   :  { %2536 = vmatpush3.bf16.msra.mxu0 %v2755_v4  ;;  %2344 = vmatprep.mubr.msk.f32.mxu0 %vm2693_vm0, %v2694_v6 }
 0x8d7   :  { %2537 = vmatprep.subr.bf16.mxu0 %v2692_v3 }
 0x8da   :  { %2539 = vmatpush3.bf16.msra.mxu0 %v2767_v9 }
 0x8db   :  { %2546 = vmatprep.subr.bf16.mxu0 %v2692_v3 }
 0x9a8   :  { %v1039_v47 = vpop.f32.mrb[10].mxu0 }
 0x9a9   :  { %v1043_v48 = vadd.f32 %v1039_v47, %v194_v46  ;;  %v2324_v49 = vpop.f32.mrb[11].mxu0  ;;  %v1733_v46 = vld [vmem:[#allocation2 + $0x10] sm:$0xff]  ;;  %v1734_v47 = vld [vmem:[#allocation2 + $0x18] sm:$0xff] }
 0x9aa   :  { %v1736_v49 = vld [vmem:[#allocation2 + $0x28] sm:$0xff] }
 0x9ab   :  { %2624 = vtanh.f32 %v1043_v48  ;;  %v1735_v48 = vld [vmem:[#allocation2 + $0x20] sm:$0xff] }
 0x9b5   :  { %v2625_v50 = vpop.eup %2624 }
 0x9b6   :  { %1045 = vst.msk [vmem:[#allocation2 + $0x50] sm:$0xff] %vm209_vm1, %v2625_v50  ;;  %2334 = vmatmul.mubr.msk.f32.vlgmr.msra.gmra.mrb[10].mxu1 %vm209_vm1, %v2625_v50  ;;  %v1737_v50 = vld [vmem:[#allocation2 + $0x30] sm:$0xff] }
 0x9b7   :  { %2542 = vmatpush3.bf16.msra.mxu1 %v2755_v4  ;;  %2355 = vmatprep.mubr.msk.f32.mxu1 %vm2693_vm0, %v2694_v6 }
 0x9b8   :  { %2543 = vmatprep.subr.bf16.mxu1 %v2692_v3 }
 0x9bb   :  { %2545 = vmatpush3.bf16.msra.mxu1 %v2767_v9 }
 0x9bc   :  { %2552 = vmatprep.subr.bf16.mxu1 %v2692_v3 }
 0xa89   :  { %v1115_v54 = vpop.f32.mrb[10].mxu1 }
 0xa8a   :  { %v1119_v55 = vadd.f32 %v1115_v54, %v195_v53  ;;  %v2335_v56 = vpop.f32.mrb[11].mxu1  ;;  %v1740_v53 = vld [vmem:[#allocation2 + $0x48] sm:$0xff]  ;;  %v144_v54 = vpop.permute.xlu0 %143 }
 0xa8c   :  { %2626 = vtanh.f32 %v1119_v55  ;;  %v175_v55 = vmul.f32 %v2818_v20, %v144_v54 }
 0xa8e   :  { %v202_v56 = vadd.f32 %v2824_v23, %v175_v55 }
 0xa96   :  { %v2627_v57 = vpop.eup %2626 }
 0xa97   :  { %1121 = vst.msk [vmem:[#allocation2 + $0x58] sm:$0xff] %vm209_vm1, %v2627_v57  ;;  %2345 = vmatmul.mubr.msk.f32.vlgmr.msra.gmra.mrb[12].mxu0 %vm209_vm1, %v2627_v57 }
 0xa98   :  { %2548 = vmatpush3.bf16.msra.mxu0 %v2755_v4  ;;  %2366 = vmatprep.mubr.msk.f32.mxu0 %vm2693_vm0, %v2694_v6 }
 0xa99   :  { %2549 = vmatprep.subr.bf16.mxu0 %v2692_v3 }
 0xa9c   :  { %2551 = vmatpush3.bf16.msra.mxu0 %v2767_v9 }
 0xa9d   :  { %2558 = vmatprep.subr.bf16.mxu0 %v2692_v3 }
 0xb6a   :  { %v1191_v61 = vpop.f32.mrb[12].mxu0 }
 0xb6b   :  { %v1195_v62 = vadd.f32 %v1191_v61, %v196_v60  ;;  %v2346_v63 = vpop.f32.mrb[13].mxu0  ;;  %v3054_v60 = vld [vmem:[%s3122_s6] ss:$0 sm:$0xff]  ;;  %s2696_s6 = smov [#allocation5]  }
 0xb6c   :  { %s2025_s3 = sshll.u32 %s2696_s6, 4  ;;  %s2026_s3 = int_to_ptr.vmem [resolvable:$true] %s2025_s3 }
 0xb6d   :  { %2628 = vtanh.f32 %v1195_v62  ;;  %s2644_s15 = scalar_lea.vmem %s2026_s3, 128  ;;  %p2649_p1 = scmp.lt.s32.totalorder %s2026_s3, %s2026_s3 }
 0xb6e   :  { %p2645_p0 = scmp.ne.s32.totalorder %s2026_s3, %s2644_s15  ;;  %p2650_p2 = scmp.lt.s32.totalorder %s2644_s15, %s2644_s15 }
 0xb70   :  { %p2651_p3 = por %p2650_p2, %p2649_p1 }
 0xb72   :  { %p2652_p4 = pnand %p2651_p3, %p2645_p0 }
 0xb77   :  { %v2629_v0 = vpop.eup %2628 }
 0xb78   :  { %1197 = vst.msk [vmem:[#allocation2 + $0x60] sm:$0xff] %vm209_vm1, %v2629_v0  ;;  %2356 = vmatmul.mubr.msk.f32.vlgmr.msra.gmra.mrb[12].mxu1 %vm209_vm1, %v2629_v0 }
 0xb79   :  { %2554 = vmatpush3.bf16.msra.mxu1 %v2755_v4  ;;  %2377 = vmatprep.mubr.msk.f32.mxu1 %vm2693_vm0, %v2694_v6 }
 0xb7a   :  { %2555 = vmatprep.subr.bf16.mxu1 %v2692_v3 }
 0xb7d   :  { %2557 = vmatpush3.bf16.msra.mxu1 %v2767_v9 }
 0xb7e   :  { %2564 = vmatprep.subr.bf16.mxu1 %v2692_v3 }
 0xb7f   :  { %v1743_v21 = vld [vmem:[#allocation2 + $0x60] sm:$0xff] }
 0xc4b   :  { %v1267_v7 = vpop.f32.mrb[12].mxu1 }
 0xc4c   :  { %v1271_v8 = vadd.f32 %v1267_v7, %v197_v5  ;;  %v2357_v10 = vpop.f32.mrb[13].mxu1 }
 0xc4d   :  { %v1741_v10 = vld [vmem:[#allocation2 + $0x50] sm:$0xff] }
 0xc4e   :  { %2630 = vtanh.f32 %v1271_v8 }
 0xc58   :  { %v2631_v11 = vpop.eup %2630 }
 0xc59   :  { %1273 = vst.msk [vmem:[#allocation2 + $0x68] sm:$0xff] %vm209_vm1, %v2631_v11  ;;  %2367 = vmatmul.mubr.msk.f32.vlgmr.msra.gmra.mrb[14].mxu0 %vm209_vm1, %v2631_v11 }
 0xc5a   :  { %2560 = vmatpush3.bf16.msra.mxu0 %v2755_v4  ;;  %2388 = vmatprep.mubr.msk.f32.mxu0 %vm2693_vm0, %v2694_v6 }
 0xc5b   :  { %2561 = vmatprep.subr.bf16.mxu0 %v2692_v3 }
 0xc5e   :  { %2563 = vmatpush3.bf16.msra.mxu0 %v2767_v9 }
 0xc5f   :  { %2570 = vmatprep.subr.bf16.mxu0 %v2692_v3 }
 0xd2c   :  { %v1343_v15 = vpop.f32.mrb[14].mxu0 }
 0xd2d   :  { %v1347_v16 = vadd.f32 %v1343_v15, %v198_v14  ;;  %v2368_v17 = vpop.f32.mrb[15].mxu0 }
 0xd2f   :  { %2632 = vtanh.f32 %v1347_v16 }
 0xd39   :  { %v2633_v18 = vpop.eup %2632 }
 0xd3a   :  { %1349 = vst.msk [vmem:[#allocation2 + $0x70] sm:$0xff] %vm209_vm1, %v2633_v18  ;;  %2378 = vmatmul.mubr.msk.f32.vlgmr.msra.gmra.mrb[14].mxu1 %vm209_vm1, %v2633_v18  ;;  %v1742_v18 = vld [vmem:[#allocation2 + $0x58] sm:$0xff] }
 0xd3b   :  { %2566 = vmatpush3.bf16.msra.mxu1 %v2755_v4  ;;  %2399 = vmatprep.mubr.msk.f32.mxu1 %vm2693_vm0, %v2694_v6 }
 0xd3c   :  { %2567 = vmatprep.subr.bf16.mxu1 %v2692_v3 }
 0xd3f   :  { %2569 = vmatpush3.bf16.msra.mxu1 %v2767_v9 }
 0xd40   :  { %2576 = vmatprep.subr.bf16.mxu1 %v2692_v3 }
 0xd41   :  { %v1745_v28 = vld [vmem:[#allocation2 + $0x70] sm:$0xff] }
 0xe0d   :  { %v1419_v24 = vpop.f32.mrb[14].mxu1 }
 0xe0e   :  { %v1423_v25 = vadd.f32 %v1419_v24, %v199_v22  ;;  %v2379_v26 = vpop.f32.mrb[15].mxu1 }
 0xe0f   :  { %v1744_v26 = vld [vmem:[#allocation2 + $0x68] sm:$0xff] }
 0xe10   :  { %2634 = vtanh.f32 %v1423_v25 }
 0xe1a   :  { %v2635_v27 = vpop.eup %2634 }
 0xe1b   :  { %1425 = vst.msk [vmem:[#allocation2 + $0x78] sm:$0xff] %vm209_vm1, %v2635_v27  ;;  %2389 = vmatmul.mubr.msk.f32.vlgmr.msra.gmra.mrb[16].mxu0 %vm209_vm1, %v2635_v27 }
 0xe1c   :  { %2572 = vmatpush3.bf16.msra.mxu0 %v2755_v4  ;;  %2410 = vmatprep.mubr.msk.f32.mxu0 %vm2693_vm0, %v2694_v6 }
 0xe1d   :  { %2573 = vmatprep.subr.bf16.mxu0 %v2692_v3 }
 0xe20   :  { %2575 = vmatpush3.bf16.msra.mxu0 %v2767_v9 }
 0xe21   :  { %2583 = vmatprep.subr.bf16.mxu0 %v2582_v37 }
 0xe22   :  { %v1746_v29 = vld [vmem:[#allocation2 + $0x78] sm:$0xff] }
 0xeee   :  { %v1495_v31 = vpop.f32.mrb[16].mxu0 }
 0xeef   :  { %v1499_v32 = vadd.f32 %v1495_v31, %v200_v30  ;;  %v2390_v33 = vpop.f32.mrb[17].mxu0 }
 0xef0   :  { %v149_v33 = vpop.permute.xlu1 %148 }
 0xef1   :  { %2636 = vtanh.f32 %v1499_v32 }
 0xefb   :  { %v2637_v34 = vpop.eup %2636 }
 0xefc   :  { %1501 = vst.msk [vmem:[#allocation2 + $0x80] sm:$0xff] %vm209_vm1, %v2637_v34  ;;  %2400 = vmatmul.mubr.msk.f32.vlgmr.msra.gmra.mrb[16].mxu1 %vm209_vm1, %v2637_v34  ;;  %v176_v34 = vmul.f32 %v2818_v20, %v149_v33 }
 0xefd   :  { %2578 = vmatpush3.bf16.msra.mxu1 %v2755_v4  ;;  %2421 = vmatprep.mubr.msk.f32.mxu1 %vm2693_vm0, %v2694_v6  ;;  %v174_v4 = vmul.f32 %v2818_v20, %v139_v38 }
 0xefe   :  { %2579 = vmatprep.subr.bf16.mxu1 %v2692_v3  ;;  %v203_v35 = vadd.f32 %v2824_v23, %v176_v34 }
 0xeff   :  { %v201_v6 = vadd.f32 %v2824_v23, %v174_v4 }
 0xf01   :  { %2581 = vmatpush3.bf16.msra.mxu1 %v2767_v9  ;;  %v1753_v9 = vld [vmem:[%s3121_s5 + $0x10] sm:$0xff] }
 0xf02   :  { %2590 = vmatprep.subr.bf16.mxu1 %v2582_v37  ;;  %v2586_v42 = vpack.c.bf16 %v1754_v41, %v1753_v9 }
 0xf03   :  { %v1747_v30 = vld [vmem:[#allocation2 + $0x80] sm:$0xff] }
 0xfcf   :  { %v1571_v39 = vpop.f32.mrb[16].mxu1 }
 0xfd0   :  { %v1575_v3 = vadd.f32 %v1571_v39, %v201_v6  ;;  %v2401_v40 = vpop.f32.mrb[17].mxu1 }
 0xfd2   :  { %2638 = vtanh.f32 %v1575_v3 }
 0xfdc   :  { %v2639_v43 = vpop.eup %2638 }
 0xfdd   :  { %1577 = vst.msk [vmem:[#allocation2 + $0x88] sm:$0xff] %vm209_vm1, %v2639_v43  ;;  %2411 = vmatmul.mubr.msk.f32.vlgmr.msra.gmra.mrb[18].mxu0 %vm209_vm1, %v2639_v43 }
 0xfde   :  { %2585 = vmatpush3.bf16.msra.mxu0 %v2582_v37  ;;  %2432 = vmatprep.mubr.msk.f32.mxu0 %vm209_vm1, %v1731_v44 }
 0xfdf   :  { %2587 = vmatprep.subr.bf16.mxu0 %v2586_v42 }
 0xfe2   :  { %2589 = vmatpush3.bf16.msra.mxu0 %v2586_v42 }
 0xfe4   :  { %v1748_v31 = vld [vmem:[#allocation2 + $0x88] sm:$0xff] }
 0xfe5   :  { %2433 = vmatmul.mubr.msk.f32.vlgmr.msra.gmra.mrb[20].mxu0 %vm209_vm1, %v1732_v45 }
 0xfe6   :  { %2435 = vmatprep.mubr.msk.f32.mxu0 %vm209_vm1, %v1733_v46 }
 0xfe9   :  { %2436 = vmatmul.mubr.msk.f32.gmra.mrb[22].mxu0 %vm209_vm1, %v1734_v47 }
 0xfea   :  { %2438 = vmatprep.mubr.msk.f32.mxu0 %vm209_vm1, %v1735_v48 }
 0xfed   :  { %2439 = vmatmul.mubr.msk.f32.gmra.mrb[24].mxu0 %vm209_vm1, %v1736_v49 }
 0xfee   :  { %2441 = vmatprep.mubr.msk.f32.mxu0 %vm209_vm1, %v1737_v50 }
 0xff1   :  { %2442 = vmatmul.mubr.msk.f32.gmra.mrb[26].mxu0 %vm209_vm1, %v1738_v51 }
 0xff2   :  { %2444 = vmatprep.mubr.msk.f32.mxu0 %vm209_vm1, %v1739_v52 }
 0xff5   :  { %2445 = vmatmul.mubr.msk.f32.gmra.mrb[28].mxu0 %vm209_vm1, %v1740_v53 }
0x10b0   :  { %v1647_v57 = vpop.f32.mrb[18].mxu0 }
0x10b1   :  { %v1651_v58 = vadd.f32 %v1647_v57, %v202_v56  ;;  %v2412_v59 = vpop.f32.mrb[19].mxu0 }
0x10b3   :  { %2640 = vtanh.f32 %v1651_v58 }
0x10b8   :  { %v2434_v61 = vpop.f32.mrb[20].mxu0 }
0x10b9   :  { %v1894_v62 = vadd.f32 %v2434_v61, %v3054_v60  ;;  %v1888_v63 = vpop.f32.mrb[21].mxu0 }
0x10ba   :  { %v1889_v0 = vadd.f32 %v3054_v60, %v1888_v63 }
0x10bb   :  { %1988 = vst [vmem:[#allocation3 + $0x8] sm:$0xff] %v1894_v62 }
0x10bc   :  { %1987 = vst [vmem:[#allocation3] sm:$0xff] %v1889_v0  ;;  %v2437_v1 = vpop.f32.mrb[22].mxu0 }
0x10bd   :  { %v2641_v2 = vpop.eup %2640  ;;  %v1904_v5 = vadd.f32 %v2437_v1, %v3054_v60  ;;  %v1898_v7 = vpop.f32.mrb[23].mxu0 }
0x10be   :  { %1653 = vst.msk [vmem:[#allocation2 + $0x90] sm:$0xff] %vm209_vm1, %v2641_v2  ;;  %v1899_v8 = vadd.f32 %v3054_v60, %v1898_v7  ;;  %2422 = vmatmul.mubr.msk.f32.vlgmr.msra.gmra.mrb[18].mxu1 %vm209_vm1, %v2641_v2 }
0x10bf   :  { %1990 = vst [vmem:[#allocation3 + $0x18] sm:$0xff] %v1904_v5  ;;  %2592 = vmatpush3.bf16.msra.mxu1 %v2582_v37  ;;  %2447 = vmatprep.mubr.msk.f32.mxu1 %vm209_vm1, %v1741_v10 }
0x10c0   :  { %1989 = vst [vmem:[#allocation3 + $0x10] sm:$0xff] %v1899_v8  ;;  %v2440_v11 = vpop.f32.mrb[24].mxu0  ;;  %2591 = vmatprep.subr.bf16.mxu1 %v2586_v42 }
0x10c1   :  { %v1914_v12 = vadd.f32 %v2440_v11, %v3054_v60  ;;  %v1908_v13 = vpop.f32.mrb[25].mxu0 }
0x10c2   :  { %v1909_v14 = vadd.f32 %v3054_v60, %v1908_v13 }
0x10c3   :  { %1992 = vst [vmem:[#allocation3 + $0x28] sm:$0xff] %v1914_v12  ;;  %2593 = vmatpush3.bf16.msra.mxu1 %v2586_v42 }
0x10c4   :  { %1991 = vst [vmem:[#allocation3 + $0x20] sm:$0xff] %v1909_v14  ;;  %v2443_v15 = vpop.f32.mrb[26].mxu0 }
0x10c5   :  { %v1924_v16 = vadd.f32 %v2443_v15, %v3054_v60  ;;  %v1918_v17 = vpop.f32.mrb[27].mxu0  ;;  %v1749_v32 = vld [vmem:[#allocation2 + $0x90] sm:$0xff] }
0x10c6   :  { %v1919_v19 = vadd.f32 %v3054_v60, %v1918_v17  ;;  %2448 = vmatmul.mubr.msk.f32.vlgmr.msra.gmra.mrb[20].mxu1 %vm209_vm1, %v1742_v18 }
0x10c7   :  { %1994 = vst [vmem:[#allocation3 + $0x38] sm:$0xff] %v1924_v16  ;;  %2450 = vmatprep.mubr.msk.f32.mxu1 %vm209_vm1, %v1743_v21 }
0x10c8   :  { %1993 = vst [vmem:[#allocation3 + $0x30] sm:$0xff] %v1919_v19  ;;  %v2446_v22 = vpop.f32.mrb[28].mxu0 }
0x10c9   :  { %v1934_v24 = vadd.f32 %v2446_v22, %v3054_v60  ;;  %v1928_v25 = vpop.f32.mrb[29].mxu0 }
0x10ca   :  { %v1929_v27 = vadd.f32 %v3054_v60, %v1928_v25  ;;  %2451 = vmatmul.mubr.msk.f32.gmra.mrb[22].mxu1 %vm209_vm1, %v1744_v26 }
0x10cb   :  { %1996 = vst [vmem:[#allocation3 + $0x48] sm:$0xff] %v1934_v24  ;;  %2453 = vmatprep.mubr.msk.f32.mxu1 %vm209_vm1, %v1745_v28 }
0x10cc   :  { %1995 = vst [vmem:[#allocation3 + $0x40] sm:$0xff] %v1929_v27 }
0x10ce   :  { %2454 = vmatmul.mubr.msk.f32.gmra.mrb[24].mxu1 %vm209_vm1, %v1746_v29 }
0x10cf   :  { %2456 = vmatprep.mubr.msk.f32.mxu1 %vm209_vm1, %v1747_v30 }
0x10d2   :  { %2457 = vmatmul.mubr.msk.f32.gmra.mrb[26].mxu1 %vm209_vm1, %v1748_v31 }
0x10d3   :  { %2459 = vmatprep.mubr.msk.f32.mxu1 %vm209_vm1, %v1749_v32 }
0x1191   :  { %v1723_v36 = vpop.f32.mrb[18].mxu1 }
0x1192   :  { %v1727_v37 = vadd.f32 %v1723_v36, %v203_v35  ;;  %v2423_v38 = vpop.f32.mrb[19].mxu1 }
0x1194   :  { %2642 = vtanh.f32 %v1727_v37 }
0x1199   :  { %v2449_v4 = vpop.f32.mrb[20].mxu1 }
0x119a   :  { %v1944_v6 = vadd.f32 %v2449_v4, %v3054_v60  ;;  %v1938_v39 = vpop.f32.mrb[21].mxu1 }
0x119b   :  { %v1939_v3 = vadd.f32 %v3054_v60, %v1938_v39 }
0x119c   :  { %1998 = vst [vmem:[#allocation3 + $0x58] sm:$0xff] %v1944_v6 }
0x119d   :  { %1997 = vst [vmem:[#allocation3 + $0x50] sm:$0xff] %v1939_v3  ;;  %v2452_v40 = vpop.f32.mrb[22].mxu1 }
0x119e   :  { %v2643_v9 = vpop.eup %2642  ;;  %v1954_v41 = vadd.f32 %v2452_v40, %v3054_v60  ;;  %v1948_v42 = vpop.f32.mrb[23].mxu1 }
0x119f   :  { %1729 = vst.msk [vmem:[#allocation2 + $0x98] sm:$0xff] %vm209_vm1, %v2643_v9  ;;  %1730 = vst.msk [vmem:[#allocation5] sm:$0xff] %vm209_vm1, %v2643_v9  ;;  %v1949_v20 = vadd.f32 %v3054_v60, %v1948_v42 }
0x11a0   :  { %2000 = vst [vmem:[#allocation3 + $0x68] sm:$0xff] %v1954_v41 }
0x11a1   :  { %1999 = vst [vmem:[#allocation3 + $0x60] sm:$0xff] %v1949_v20  ;;  %v2455_v23 = vpop.f32.mrb[24].mxu1 }
0x11a2   :  { %v1964_v43 = vadd.f32 %v2455_v23, %v3054_v60  ;;  %v1958_v44 = vpop.f32.mrb[25].mxu1 }
0x11a3   :  { %v1959_v45 = vadd.f32 %v3054_v60, %v1958_v44 }
0x11a4   :  { %2002 = vst [vmem:[#allocation3 + $0x78] sm:$0xff] %v1964_v43 }
0x11a5   :  { %2001 = vst [vmem:[#allocation3 + $0x70] sm:$0xff] %v1959_v45  ;;  %v2458_v46 = vpop.f32.mrb[26].mxu1 }
0x11a6   :  { %v1974_v47 = vadd.f32 %v2458_v46, %v3054_v60  ;;  %v1968_v48 = vpop.f32.mrb[27].mxu1  ;;  %v1750_v49 = vld [vmem:[#allocation2 + $0x98] sm:$0xff] }
0x11a7   :  { %v1969_v50 = vadd.f32 %v3054_v60, %v1968_v48  ;;  %2460 = vmatmul.mubr.msk.f32.gmra.mrb[28].mxu1 %vm209_vm1, %v1750_v49 }
0x11a8   :  { %2004 = vst [vmem:[#allocation3 + $0x88] sm:$0xff] %v1974_v47 }
0x11a9   :  { %2003 = vst [vmem:[#allocation3 + $0x80] sm:$0xff] %v1969_v50 }
0x11aa   :  { %2655 = shalt.err (!%p2652_p4)
}
0x11ab   :  { %s2656_s18 = scalar_lea.hbm %s3124_s8, 128 }
0x11ac   :  { %p2657_p5 = scmp.ne.s32.totalorder %s3124_s8, %s2656_s18  ;;  %p2660_p6 = scmp.lt.u32.totalorder %s2656_s18, %s3124_s8 }
0x11ae   :  { %p2662_p7 = pnand %p2660_p6, %p2657_p5 }
0x11b0   :  { %2665 = shalt.err (!%p2662_p7)
}
0x11b1   :  { %2028 = dma.vmem_to_hbm [thread:$0]  %s2026_s3, 128, %s3124_s8, [#allocation6]  }
0x11b2   :  { %s2697_s24 = smov [#allocation3]  }
0x11b3   :  { %s2012_s25 = sshll.u32 %s2697_s24, 4  ;;  %s2013_s25 = int_to_ptr.vmem [resolvable:$true] %s2012_s25 }
0x11b4   :  { %s2666_s26 = scalar_lea.vmem %s2013_s25, 2560  ;;  %p2671_p9 = scmp.lt.s32.totalorder %s2013_s25, %s2013_s25 }
0x11b5   :  { %p2667_p8 = scmp.ne.s32.totalorder %s2013_s25, %s2666_s26  ;;  %p2672_p10 = scmp.lt.s32.totalorder %s2666_s26, %s2666_s26 }
0x11b7   :  { %p2673_p11 = por %p2672_p10, %p2671_p9 }
0x11b9   :  { %p2674_p12 = pnand %p2673_p11, %p2667_p8 }
0x127a   :  { %v2461_v51 = vpop.f32.mrb[28].mxu1 }
0x127b   :  { %v1984_v52 = vadd.f32 %v2461_v51, %v3054_v60  ;;  %v1978_v53 = vpop.f32.mrb[29].mxu1 }
0x127c   :  { %v1979_v54 = vadd.f32 %v3054_v60, %v1978_v53 }
0x127d   :  { %2006 = vst [vmem:[#allocation3 + $0x98] sm:$0xff] %v1984_v52 }
0x127e   :  { %2005 = vst [vmem:[#allocation3 + $0x90] sm:$0xff] %v1979_v54 }
0x127f   :  { %2677 = shalt.err (!%p2674_p12)
}
0x1280   :  { %s2678_s28 = scalar_lea.hbm %s3123_s7, 2560 }
0x1281   :  { %p2679_p13 = scmp.ne.s32.totalorder %s3123_s7, %s2678_s28  ;;  %p2682_p0 = scmp.lt.u32.totalorder %s2678_s28, %s3123_s7 }
0x1283   :  { %p2684_p1 = pnand %p2682_p0, %p2679_p13 }
0x1285   :  { %2687 = shalt.err (!%p2684_p1)
}
0x1286   :  { %s2698_s10 = smov 128   ;;  %s2699_s11 = smov 8  }
0x1287   :  { %2018 = dma.vmem_to_hbm [thread:$0]  %s2013_s25, 2560, %s3123_s7, [#allocation4], %s2698_s10, %s2698_s10, %s2699_s11  }
0x1288   :  { %2688 = dma.done.wait [#allocation4], 2560  }
0x1289   :  { %2689 = vsyncadd [#allocation4], 4294964736 }
0x128a   :  { %2690 = dma.done.wait [#allocation6], 128  }
0x128b   :  { %2691 = vsyncadd [#allocation6], 4294967168 }
0x128c   :  { %2035 = vsyncpa [#allocation4], 1 }
0x128d   :  { %2036 = vsyncpa [#allocation6], 1 }

</bundles_post_ra>
